<compile_context>
chip_gen: v5e
topology: v5e:2x2
jax: 0.10.0
libtpu: 0.0.40
codegen_flags: <defaults>
</compile_context>

<pallas_src>
import functools

import jax
import jax.numpy as jnp
from jax.experimental import pallas as pl
from jax.experimental.pallas import tpu as pltpu


def _round_up(x, m):
    return (x + m - 1) // m * m


# Contract x's last dim with weight's last dim  ==  x @ weight.T
# (the MXU consumes the (N, K) weight as a transposed RHS; no transpose pass).
_DOT_DIMS = (((1,), (1,)), ((), ()))

# Grid-less single-block path threshold (~1/4 of v5e's 16 MiB scoped default).
_SMALL_BYTES = 4 * 1024 * 1024

# Collapse the K grid axis (tk = full K) when round_up(K, 128) <= this.
_FULLK_MAX = 2048

# Explicit scoped-VMEM limit: above the v5e/v6e defaults, below v7x's 64 MiB
# physical VMEM per TensorCore.
_VMEM_LIMIT_BYTES = 48 * 1024 * 1024


@functools.lru_cache(maxsize=None)
def _default_tiles():
    """Generation-aware preferred tile sizes (clamped to the problem later)."""
    try:
        vmem = pltpu.get_tpu_info().vmem_capacity_bytes
    except Exception:  # query unavailable -> conservative defaults
        vmem = 0
    if vmem >= 96 * 1024 * 1024:     # v5e / v6e: 128 MiB VMEM
        return 512, 1024, 2048
    if vmem > 0:                     # v7x: 64 MiB VMEM per TensorCore
        return 512, 512, 1024
    return 256, 512, 1024            # safe fallback for any chip


def _pick_tile(dim, preferred, align):
    """Full dim if it fits in `preferred`, else an aligned divisor of
    round_up(dim, align) <= preferred (never violates the (8,128) rule and
    avoids tile-induced padding waste)."""
    d = _round_up(dim, align)
    if d <= preferred:
        return dim                   # full-extent block: always legal, no waste
    t = max(align, (preferred // align) * align)
    while t > align:
        if d % t == 0:
            return t
        t -= align
    return align


def _maybe_cast(xv, wv, compute_dtype):
    if compute_dtype is not None:
        xv = xv.astype(compute_dtype)
        wv = wv.astype(compute_dtype)
    return xv, wv


# --------------------------------------------------------------------------
# Kernels
# --------------------------------------------------------------------------
def _full_block_kernel(x_ref, w_ref, o_ref, *, compute_dtype):
    """Whole problem (grid-less) or one (i, j) tile when tk == full K."""
    xv, wv = _maybe_cast(x_ref[...], w_ref[...], compute_dtype)
    acc = jax.lax.dot_general(
        xv, wv, dimension_numbers=_DOT_DIMS,
        preferred_element_type=jnp.float32)
    o_ref[...] = jax.nn.sigmoid(acc).astype(o_ref.dtype)


def _splitk_partial(x_ref, w_ref, compute_dtype, k_valid, tk):
    k = pl.program_id(2)
    xv = x_ref[...]
    if k_valid is not None:
        # K tail is not tile-aligned: zero x's out-of-range columns so garbage
        # in the padded region of the edge K block never reaches the sum
        # (zero * anything == 0, so the weight tile needs no mask).
        col = jax.lax.broadcasted_iota(jnp.int32, xv.shape, 1)
        xv = jnp.where(col < (k_valid - k * tk), xv, 0)
    xv, wv = _maybe_cast(xv, w_ref[...], compute_dtype)
    return jax.lax.dot_general(
        xv, wv, dimension_numbers=_DOT_DIMS,
        preferred_element_type=jnp.float32)


def _splitk_kernel_accum_out(x_ref, w_ref, o_ref, *, compute_dtype, k_valid, tk):
    """Split-K, fp32 output: accumulate straight into the resident output
    block (its index_map ignores k) -- no scratch, no final copy."""
    k = pl.program_id(2)
    part = _splitk_partial(x_ref, w_ref, compute_dtype, k_valid, tk)

    @pl.when(k == 0)
    def _():
        o_ref[...] = part

    @pl.when(k > 0)
    def _():
        o_ref[...] += part

    @pl.when(k == pl.num_programs(2) - 1)
    def _():
        o_ref[...] = jax.nn.sigmoid(o_ref[...])


def _splitk_kernel_scratch(x_ref, w_ref, o_ref, acc_ref, *,
                           compute_dtype, k_valid, tk):
    """Split-K, non-fp32 output: fp32 VMEM accumulator, cast on final store."""
    k = pl.program_id(2)
    part = _splitk_partial(x_ref, w_ref, compute_dtype, k_valid, tk)

    @pl.when(k == 0)
    def _():
        acc_ref[...] = part

    @pl.when(k > 0)
    def _():
        acc_ref[...] += part

    @pl.when(k == pl.num_programs(2) - 1)
    def _():
        o_ref[...] = jax.nn.sigmoid(acc_ref[...]).astype(o_ref.dtype)


# --------------------------------------------------------------------------
# Wrapper
# --------------------------------------------------------------------------
@functools.partial(jax.jit, static_argnames=("compute_dtype", "tm", "tn", "tk"))
def _my_linear_impl(x, weight, *, compute_dtype, tm, tn, tk):
    batch, in_features = x.shape
    out_features = weight.shape[0]
    out_dtype = x.dtype

    itemsize = jnp.dtype(x.dtype).itemsize
    out_itemsize = jnp.dtype(out_dtype).itemsize
    total_bytes = itemsize * (
        batch * in_features + out_features * in_features) \
        + out_itemsize * batch * out_features

    # ---- Tiny shapes: grid-less, whole operands resident in VMEM. ----------
    if total_bytes <= _SMALL_BYTES:
        return pl.pallas_call(
            functools.partial(_full_block_kernel, compute_dtype=compute_dtype),
            out_shape=jax.ShapeDtypeStruct((batch, out_features), out_dtype),
            in_specs=[
                pl.BlockSpec(memory_space=pltpu.MemorySpace.VMEM),
                pl.BlockSpec(memory_space=pltpu.MemorySpace.VMEM),
            ],
            out_specs=pl.BlockSpec(memory_space=pltpu.MemorySpace.VMEM),
        )(x, weight)

    # ---- Tiled paths: no wrapper-side pad / slice / astype. -----------------
    tm = _pick_tile(batch, tm, 8)
    tn = _pick_tile(out_features, tn, 128)
    grid_m = pl.cdiv(batch, tm)
    grid_n = pl.cdiv(out_features, tn)

    # v7x megacore: ensure the parallel (M, N) grid has >= 2 tiles so the
    # second TensorCore is not idle.
    if grid_m * grid_n == 1:
        tn_half = _pick_tile(out_features, max(128, tn // 2), 128)
        if tn_half < tn:
            tn = tn_half
            grid_n = pl.cdiv(out_features, tn)

    cost = pl.CostEstimate(
        flops=2 * batch * out_features * in_features,
        transcendentals=batch * out_features,
        bytes_accessed=itemsize * in_features * (batch + out_features)
        + out_itemsize * batch * out_features,
    )

    # ---- 2-D path: K fits one tile -> no reduction axis, no accumulator. ---
    if _round_up(in_features, 128) <= max(_FULLK_MAX, tk):
        return pl.pallas_call(
            functools.partial(_full_block_kernel, compute_dtype=compute_dtype),
            out_shape=jax.ShapeDtypeStruct((batch, out_features), out_dtype),
            grid=(grid_m, grid_n),
            in_specs=[
                pl.BlockSpec((tm, in_features), lambda i, j: (i, 0)),
                pl.BlockSpec((tn, in_features), lambda i, j: (j, 0)),
            ],
            out_specs=pl.BlockSpec((tm, tn), lambda i, j: (i, j)),
            compiler_params=pltpu.CompilerParams(
                dimension_semantics=("parallel", "parallel"),
                vmem_limit_bytes=_VMEM_LIMIT_BYTES),
            cost_estimate=cost,
        )(x, weight)

    # ---- 3-D split-K path. --------------------------------------------------
    tk = _pick_tile(in_features, tk, 128)
    grid_k = pl.cdiv(in_features, tk)
    k_valid = in_features if (in_features % tk) else None   # static mask switch

    kern_kwargs = dict(compute_dtype=compute_dtype, k_valid=k_valid, tk=tk)
    common = dict(
        out_shape=jax.ShapeDtypeStruct((batch, out_features), out_dtype),
        grid=(grid_m, grid_n, grid_k),
        in_specs=[
            pl.BlockSpec((tm, tk), lambda i, j, k: (i, k)),   # x tile
            pl.BlockSpec((tn, tk), lambda i, j, k: (j, k)),   # weight tile
        ],
        out_specs=pl.BlockSpec((tm, tn), lambda i, j, k: (i, j)),
        compiler_params=pltpu.CompilerParams(
            dimension_semantics=("parallel", "parallel", "arbitrary"),
            vmem_limit_bytes=_VMEM_LIMIT_BYTES),
        cost_estimate=cost,
    )

    if jnp.dtype(out_dtype) == jnp.float32:
        return pl.pallas_call(
            functools.partial(_splitk_kernel_accum_out, **kern_kwargs),
            **common,
        )(x, weight)
    return pl.pallas_call(
        functools.partial(_splitk_kernel_scratch, **kern_kwargs),
        scratch_shapes=[pltpu.VMEM((tm, tn), jnp.float32)],
        **common,
    )(x, weight)


def my_linear_forward(x, weight, *, compute_dtype=None, tm=None, tn=None, tk=None):
    """Forward of MyLinear: sigmoid(x @ weight.T).

    compute_dtype: optionally cast the VMEM tiles (in-kernel, zero extra HBM
    traffic) for the matmul, e.g. jnp.bfloat16 on v6e/v7x; accumulation and
    the sigmoid epilogue stay in fp32.
    """
    _, in_features = x.shape
    _, in_features_w = weight.shape
    if in_features != in_features_w:
        # Mirror the PyTorch module's behavior (print + return 0).
        print(
            f"Wrong Input Features. Please use tensor with "
            f"{in_features_w} Input Features"
        )
        return 0
    d_tm, d_tn, d_tk = _default_tiles()
    return _my_linear_impl(
        x, weight, compute_dtype=compute_dtype,
        tm=tm or d_tm, tn=tn or d_tn, tk=tk or d_tk,
    )
    # TODO(synk): update()/MSELoss backward (training step) is not implemented;
    # only the forward pass is translated.


if __name__ == "__main__":
    key = jax.random.PRNGKey(0)
    k_x, k_w, k_x2, k_w2, k_x3, k_w3 = jax.random.split(key, 6)

    # --- 1) Small module-consistent shape -> grid-less single-block path. ---
    batch, in_features, out_features = 8, 32, 16
    x = jax.random.normal(k_x, (batch, in_features), dtype=jnp.float32)
    w = jax.random.normal(k_w, (out_features, in_features), dtype=jnp.float32)

    out = jax.block_until_ready(my_linear_forward(x, w))
    ref = jax.nn.sigmoid(x @ w.T)
    assert out.shape == (batch, out_features)
    assert jnp.allclose(out, ref, atol=1e-5, rtol=1e-5)

    # --- 2) Larger, non-128-aligned shape -> 2-D tiled full-K path (edge
    #        blocks masked by Pallas; no wrapper padding or slicing). --------
    b2, k2, n2 = 500, 1000, 384
    x2 = jax.random.normal(k_x2, (b2, k2), dtype=jnp.float32)
    w2 = jax.random.normal(k_w2, (n2, k2), dtype=jnp.float32)

    # 2a) fp32 operands (default path); loose tolerance vs a high-precision
    #     reference only to absorb matmul-precision differences.
    out2 = jax.block_until_ready(my_linear_forward(x2, w2))
    ref2_hi = jax.nn.sigmoid(
        jnp.matmul(x2, w2.T, precision=jax.lax.Precision.HIGHEST))
    assert out2.shape == (b2, n2)
    assert jnp.allclose(out2, ref2_hi, atol=2e-2, rtol=2e-2)

    # 2b) bf16 operands via in-kernel cast, fp32 accumulation.
    out2b = jax.block_until_ready(
        my_linear_forward(x2, w2, compute_dtype=jnp.bfloat16))
    ref2b = jax.nn.sigmoid(
        jnp.matmul(x2.astype(jnp.bfloat16), w2.astype(jnp.bfloat16).T,
                   preferred_element_type=jnp.float32))
    assert jnp.allclose(out2b, ref2b, atol=1e-4, rtol=1e-4)

    # --- 3) Large K -> 3-D split-K path, accumulating into the resident fp32
    #        output block, bf16 in-kernel cast, megacore N split. ------------
    b3, k3, n3 = 256, 4096, 512
    x3 = jax.random.normal(k_x3, (b3, k3), dtype=jnp.float32)
    w3 = jax.random.normal(k_w3, (n3, k3), dtype=jnp.float32)

    out3 = jax.block_until_ready(
        my_linear_forward(x3, w3, compute_dtype=jnp.bfloat16))
    ref3 = jax.nn.sigmoid(
        jnp.matmul(x3.astype(jnp.bfloat16), w3.astype(jnp.bfloat16).T,
                   preferred_element_type=jnp.float32))
    assert out3.shape == (b3, n3)
    assert jnp.allclose(out3, ref3, atol=1e-3, rtol=1e-3)

    # Mismatched in_features mirrors the torch module (prints + returns 0).
    assert my_linear_forward(x, w2) == 0

    print("KERNEL_OK")
</pallas_src>

<mosaic_0001>
module attributes {stable_mosaic.version = 11 : i64} {
  func.func @_full_block_kernel(%arg0: memref<8x32xf32, #tpu.memory_space<vmem>>, %arg1: memref<16x32xf32, #tpu.memory_space<vmem>>, %arg2: memref<8x16xf32, #tpu.memory_space<vmem>>) attributes {dimension_semantics = [], scalar_prefetch = 0 : i64, scratch_operands = 0 : i64, tpu.core_type = #tpu.core_type<tc>} {
    %c0 = arith.constant 0 : index
    %c0_0 = arith.constant 0 : index
    %0 = vector.load %arg0[%c0, %c0_0] : memref<8x32xf32, #tpu.memory_space<vmem>>, vector<8x32xf32>
    %c0_1 = arith.constant 0 : index
    %c0_2 = arith.constant 0 : index
    %1 = vector.load %arg1[%c0_1, %c0_2] : memref<16x32xf32, #tpu.memory_space<vmem>>, vector<16x32xf32>
    %cst = arith.constant dense<0.000000e+00> : vector<8x16xf32>
    %2 = tpu.matmul %0, %1, %cst {dimension_numbers = #tpu.dot_dimension_numbers<[1], [1], [0], [0], [0, 0, 1, 0], [], []>} : vector<8x32xf32>, vector<16x32xf32>, vector<8x16xf32> -> vector<8x16xf32>
    %3 = arith.negf %2 : vector<8x16xf32>
    %4 = math.exp %3 : vector<8x16xf32>
    %cst_3 = arith.constant 1.000000e+00 : f32
    %5 = vector.broadcast %cst_3 : f32 to vector<8x16xf32>
    %6 = arith.addf %5, %4 : vector<8x16xf32>
    %7 = arith.divf %5, %6 : vector<8x16xf32>
    %c0_4 = arith.constant 0 : index
    %c0_5 = arith.constant 0 : index
    %8 = vector.load %arg2[%c0_4, %c0_5] : memref<8x16xf32, #tpu.memory_space<vmem>>, vector<8x16xf32>
    tpu.vector_store %arg2[%c0_4, %c0_5], %7 {strides = array<i32>} : memref<8x16xf32, #tpu.memory_space<vmem>>, vector<8x16xf32>,
    return
  }
}

</mosaic_0001>

<bundles_post_ra>
// kernel: _my_linear_impl.1
= control target key start
LH: loop header
LB: loop body
LE: loop exit
PB: predicated region body
PF: predicated region fallthrough
CT: control target
= control target key end

     0   :  { %7 = vsyncpa [#allocation3], 0  ;;  %s234_s0 = inlined_call_operand.hbm [shape: f32[8,32], index: 0, kind: input, shape index: {}]   ;;  %s235_s1 = inlined_call_operand.hbm [shape: f32[16,32], index: 1, kind: input, shape index: {}]   ;;  %s236_s2 = inlined_call_operand.hbm [shape: f32[8,16], index: 2, kind: output, shape index: {}]  }
   0x1   :  { %8 = vsyncpa [#allocation6], 0 }
   0x2   :  { %9 = vsyncpa [#allocation4], 0  ;;  %s15_s11 = sshll.u32 %s234_s0, 4  ;;  %s205_s12 = smov [#allocation2]   ;;  %s16_s11 = int_to_ptr.hbm [resolvable:$true] %s15_s11 }
   0x3   :  { %s17_s13 = sshll.u32 %s205_s12, 4  ;;  %s25_s16 = sshll.u32 %s235_s1, 4  ;;  %s18_s13 = int_to_ptr.vmem [resolvable:$true] %s17_s13  ;;  %s26_s16 = int_to_ptr.hbm [resolvable:$true] %s25_s16 }
   0x4   :  { %20 = dma.hbm_to_vmem [thread:$0]  %s16_s11, 128, %s18_s13, [#allocation3]  }
   0x5   :  { %s206_s17 = smov [#allocation5]   ;;  %s207_s19 = smov 128  }
   0x6   :  { %s27_s18 = sshll.u32 %s206_s17, 4  ;;  %s208_s20 = smov 8   ;;  %s28_s18 = int_to_ptr.vmem [resolvable:$true] %s27_s18 }
   0x7   :  { %33 = dma.hbm_to_vmem [thread:$0]  %s26_s16, 256, %s28_s18, [#allocation6], %s207_s19, %s207_s19, %s208_s20  }
   0x8   :  { %199 = dma.done.wait [#allocation3], 128  }
   0x9   :  { %200 = vsyncadd [#allocation3], 4294967168 }
   0xa   :  { %201 = dma.done.wait [#allocation6], 256  }
   0xb   :  { %202 = vsyncadd [#allocation6], 4294967040  ;;  %vm45_vm0 = vcmask 261120   ;;  %v44_v0 = vld [vmem:[#allocation5 + $0x8] sm:$0xff]  ;;  %v43_v1 = vld [vmem:[#allocation5] sm:$0xff]  ;;  %s209_s0 = smov [#allocation7]  }
   0xc   :  { %114 = vmatpush.xpose.msk.msra.mxu0 %vm45_vm0, %v44_v0  ;;  %v42_v2 = vld [vmem:[#allocation2] sm:$0xff]  ;;  %s101_s1 = sshll.u32 %s209_s0, 4  ;;  %s103_s23 = sshll.u32 %s236_s2, 4  ;;  %vm94_vm4 = vcmask 130048   ;;  %s102_s1 = int_to_ptr.vmem [resolvable:$true] %s101_s1  ;;  %s104_s23 = int_to_ptr.hbm [resolvable:$true] %s103_s23 }
  0x10   :  { %115 = vmatpush.xpose.msk.msra.mxu0 %vm45_vm0, %v43_v1 }
  0x13   :  { %116 = vmatmul.msk.f32.vlgmr.msra.gmra.mxu0 %vm45_vm0, %v42_v2 }
  0x90   :  { %v72_v3 = vpop.f32.mrf.mxu0 }
  0x91   :  { %v117_v4 = vmul.f32 -1.442695, %v72_v3 }
  0x93   :  { %123 = vpow2.f32 %v117_v4 }
  0x99   :  { %v124_v5 = vpop.eup %123 }
  0x9a   :  { %v78_v6 = vadd.f32 1.0, %v124_v5 }
  0x9c   :  { %125 = vrcp.f32 %v78_v6  ;;  %v90_v10 = vand.u32 2147483648, %v78_v6  ;;  %v88_v12 = vand.u32 2147483647, %v78_v6  ;;  %vm84_vm2 = vweird.f32 %v78_v6 }
  0x9e   :  { %v91_v14 = vor.u32 1.1754944e-38, %v90_v10  ;;  %vm89_vm5 = vcmp.eq.f32.partialorder %v88_v12, 8.507059e+37 }
  0xa2   :  { %v126_v7 = vpop.eup %125 }
  0xa3   :  { %v80_v8 = vmul.f32 %v126_v7, %v78_v6  ;;  %vm85_vm1 = vweird.f32 %v126_v7 }
  0xa4   :  { %vm86_vm3 = vmor %vm84_vm2, %vm85_vm1 }
  0xa5   :  { %v81_v9 = vsub.f32 1.0, %v80_v8 }
  0xa7   :  { %v82_v11 = vmul.f32 %v126_v7, %v81_v9 }
  0xa9   :  { %v83_v13 = vadd.f32 %v126_v7, %v82_v11 }
  0xab   :  { %v87_v15 = vsel %vm86_vm3, %v126_v7, %v83_v13 }
  0xac   :  { %v92_v16 = vsel %vm89_vm5, %v91_v14, %v87_v15 }
  0xad   :  { %95 = vst.msk [vmem:[#allocation7] sm:$0xff] %vm94_vm4, %v92_v16 }
  0xae   :  { %106 = dma.vmem_to_hbm [thread:$0]  %s102_s1, 128, %s104_s23, [#allocation4]  }
  0xaf   :  { %203 = dma.done.wait [#allocation4], 128  }
  0xb0   :  { %204 = vsyncadd [#allocation4], 4294967168 }
  0xb1   :  { %111 = vsyncpa [#allocation3], 1 }
  0xb2   :  { %112 = vsyncpa [#allocation6], 1 }
  0xb3   :  { %113 = vsyncpa [#allocation4], 1 }

</bundles_post_ra>
